<compile_context>
chip_gen: v6e
topology: v6e:2x2x1
jax: 0.10.0
libtpu: 0.0.40
codegen_flags: <defaults>
</compile_context>

<pallas_src>
import jax
import jax.numpy as jnp
from jax import lax
from jax.experimental import pallas as pl
from jax.experimental.pallas import tpu as pltpu


def _round_up(n: int, m: int) -> int:
    return ((n + m - 1) // m) * m


def _classifier_kernel(x_ref, ecols_ref, w1_ref, b1_ref, w2_ref, b2_ref, o_ref):
    x = x_ref[...]                                            # (TB, KP) f32, zero-padded lanes >= D
    eps = jnp.float32(1e-8)

    # 1/||x|| (padded lanes are zero so the norm covers only the real D features).
    x_sq = jnp.sum(x * x, axis=-1, keepdims=True)             # (TB, 1) f32  (XLU reduce)
    x_rnorm = lax.rsqrt(jnp.maximum(x_sq, eps * eps))         # EUP rsqrt

    xb = x.astype(jnp.bfloat16)

    # Cosine similarities landing directly on the lanes layer1 expects.  ecols'
    # only nonzero columns are e_k/||e_k||, so every other lane of `sims` is 0.
    sims = jnp.dot(xb, ecols_ref[...],
                   preferred_element_type=jnp.float32) * x_rnorm      # (TB, 128) f32

    # Augmented input [x, s1, s2, s3] with no lane concatenation.
    kp = x.shape[1]
    if kp == 128:
        x_aug = x + sims
    else:
        # Sim lanes always live in the last 128-lane block of the padded width.
        x_aug = jnp.concatenate([x[:, : kp - 128], x[:, kp - 128:] + sims], axis=-1)

    # layer1: relu(x_aug @ W1.T + b1) — one lane-dense bf16 MXU matmul, [K,N] RHS.
    h = jnp.dot(x_aug.astype(jnp.bfloat16), w1_ref[...],
                preferred_element_type=jnp.float32)                    # (TB, H)
    h = jnp.maximum(h + b1_ref[...], 0.0)

    # layer2: h @ W2.T + b2 (num_classes padded to 128 lanes).
    y = jnp.dot(h.astype(jnp.bfloat16), w2_ref[...],
                preferred_element_type=jnp.float32)                    # (TB, OUTP)
    o_ref[...] = (y + b2_ref[...]).astype(o_ref.dtype)


def simple_classifier_with_similarity(x, class_embs, w1, b1, w2, b2):
    """x: [B, D] f32; class_embs: 3 arrays reshapeable to [1, D]; w1: [H, D+3];
    b1: [H]; w2: [OUT, H]; b2: [OUT].  Returns [B, OUT] f32 logits."""
    B, D = x.shape
    H, IN1 = w1.shape
    OUT = w2.shape[0]
    n_sim = len(class_embs)
    assert IN1 == D + n_sim, "layer1 in_features must equal inputs_dim + 3"

    KP = _round_up(IN1, 128)                   # lane-padded layer-1 contraction dim (=128 here)
    OUTP = _round_up(max(OUT, 128), 128)       # lane-padded num_classes

    # --- normalized class embeddings as columns of a (KP, 128) matrix, placed at
    # the lanes layer1 reserves for the similarities (inside the last 128 block).
    emb = jnp.concatenate([jnp.reshape(e, (1, D)).astype(jnp.float32)
                           for e in class_embs], axis=0)               # (3, D)
    e_nrm = jnp.sqrt(jnp.sum(emb * emb, axis=-1, keepdims=True))
    emb_n = emb / jnp.maximum(e_nrm, 1e-8)                             # (3, D)
    col0 = IN1 - n_sim - (KP - 128)            # column of s1 within the last 128-lane block
    assert 0 <= col0 and col0 + n_sim <= 128, "similarity lanes must fit the last 128-lane block"
    e_cols = (jnp.zeros((KP, 128), jnp.float32)
              .at[:D, col0:col0 + n_sim].set(emb_n.T)
              .astype(jnp.bfloat16))                                   # (KP, 128) bf16

    # --- weights in canonical [K, N] layout, lane-padded, bf16 MXU operands.
    w1_t = (jnp.zeros((KP, H), jnp.bfloat16)
            .at[:IN1, :].set(jnp.transpose(w1).astype(jnp.bfloat16)))  # (KP, H)
    b1_2d = b1.reshape(1, H).astype(jnp.float32)
    w2_t = (jnp.zeros((H, OUTP), jnp.bfloat16)
            .at[:, :OUT].set(jnp.transpose(w2).astype(jnp.bfloat16)))  # (H, OUTP)
    b2_2d = jnp.zeros((1, OUTP), jnp.float32).at[0, :OUT].set(b2.astype(jnp.float32))

    # --- batch tiling: pad B to the tile; >= 2 "parallel" steps (both v7x TCs)
    # whenever the batch allows it; tile capped at 512 rows for large B.
    if B <= 8:
        TB = 8
    else:
        TB = min(512, _round_up((B + 1) // 2, 8))
    BP = _round_up(B, TB)
    grid = (BP // TB,)

    xp = jnp.zeros((BP, KP), jnp.float32).at[:B, :D].set(x.astype(jnp.float32))

    bcast = lambda i: (0, 0)
    flops = 2 * BP * (KP * 128 + KP * H + H * OUTP) + 6 * BP * KP
    bytes_accessed = (xp.size * 4 + e_cols.size * 2 + w1_t.size * 2 + b1_2d.size * 4
                      + w2_t.size * 2 + b2_2d.size * 4 + BP * OUTP * 4)

    out_p = pl.pallas_call(
        _classifier_kernel,
        out_shape=jax.ShapeDtypeStruct((BP, OUTP), jnp.float32),
        grid=grid,
        in_specs=[
            pl.BlockSpec((TB, KP), lambda i: (i, 0)),   # x (batch-tiled, lane-padded)
            pl.BlockSpec((KP, 128), bcast),             # normalized class embeddings (bf16)
            pl.BlockSpec((KP, H), bcast),               # W1.T padded  (bf16, [K,N])
            pl.BlockSpec((1, H), bcast),                # b1
            pl.BlockSpec((H, OUTP), bcast),             # W2.T padded  (bf16, [K,N])
            pl.BlockSpec((1, OUTP), bcast),             # b2 padded
        ],
        out_specs=pl.BlockSpec((TB, OUTP), lambda i: (i, 0)),
        compiler_params=pltpu.CompilerParams(dimension_semantics=("parallel",)),
        cost_estimate=pl.CostEstimate(flops=flops, transcendentals=BP,
                                      bytes_accessed=bytes_accessed),
    )(xp, e_cols, w1_t, b1_2d, w2_t, b2_2d)

    return out_p[:B, :OUT]


if __name__ == "__main__":
    NUM_CLASSES = 10
    EMB_DIM = 32                    # module's embedding_dim
    D_IN = 4 * EMB_DIM - 3          # = 125: +3 similarity cols -> layer1 in = 4*EMB_DIM = 128
    HIDDEN = 512
    BATCH = 8

    key = jax.random.PRNGKey(0)
    kx, ke1, ke2, ke3, kw1, kb1, kw2, kb2 = jax.random.split(key, 8)

    x = jax.random.normal(kx, (BATCH, D_IN), dtype=jnp.float32)
    e1 = jax.random.normal(ke1, (1, D_IN), dtype=jnp.float32)
    e2 = jax.random.normal(ke2, (1, D_IN), dtype=jnp.float32)
    e3 = jax.random.normal(ke3, (1, D_IN), dtype=jnp.float32)

    k1 = 1.0 / float(jnp.sqrt(jnp.float32(4 * EMB_DIM)))
    k2 = 1.0 / float(jnp.sqrt(jnp.float32(HIDDEN)))
    w1 = jax.random.uniform(kw1, (HIDDEN, 4 * EMB_DIM), jnp.float32, -k1, k1)
    b1 = jax.random.uniform(kb1, (HIDDEN,), jnp.float32, -k1, k1)
    w2 = jax.random.uniform(kw2, (NUM_CLASSES, HIDDEN), jnp.float32, -k2, k2)
    b2 = jax.random.uniform(kb2, (NUM_CLASSES,), jnp.float32, -k2, k2)

    out = simple_classifier_with_similarity(x, (e1, e2, e3), w1, b1, w2, b2)
    out = jax.block_until_ready(out)

    # Pure-JAX f32 reference (same math as the PyTorch module's forward).
    def cos(a, b):
        num = jnp.sum(a * b, axis=-1)
        den = jnp.linalg.norm(a, axis=-1) * jnp.linalg.norm(b, axis=-1)
        return num / jnp.maximum(den, 1e-8)

    s1 = cos(x, e1).reshape(-1, 1)
    s2 = cos(x, e2).reshape(-1, 1)
    s3 = cos(x, e3).reshape(-1, 1)
    xc = jnp.concatenate([x, s1, s2, s3], axis=1)
    h_ref = jnp.maximum(xc @ w1.T + b1, 0.0)
    ref = h_ref @ w2.T + b2

    assert out.shape == (BATCH, NUM_CLASSES)
    # bf16 MXU operands with f32 accumulation -> relaxed tolerance vs f32 ref.
    err = float(jnp.max(jnp.abs(out - ref)))
    assert jnp.allclose(out, ref, atol=5e-2, rtol=5e-2), f"max abs err = {err}"

    print("KERNEL_OK")
</pallas_src>

<mosaic_0001>
module attributes {stable_mosaic.version = 11 : i64} {
  func.func @_classifier_kernel(%arg0: i32, %arg1: memref<8x128xf32, #tpu.memory_space<vmem>>, %arg2: memref<128x128xbf16, #tpu.memory_space<vmem>>, %arg3: memref<128x512xbf16, #tpu.memory_space<vmem>>, %arg4: memref<1x512xf32, #tpu.memory_space<vmem>>, %arg5: memref<512x128xbf16, #tpu.memory_space<vmem>>, %arg6: memref<1x128xf32, #tpu.memory_space<vmem>>, %arg7: memref<8x128xf32, #tpu.memory_space<vmem>>) attributes {dimension_semantics = [#tpu.dimension_semantics<parallel>], iteration_bounds = array<i64: 1>, scalar_prefetch = 0 : i64, scratch_operands = 0 : i64, tpu.core_type = #tpu.core_type<tc>, window_params = [{transform_indices = @transform_0, window_bounds = array<i64: 8, 128>}, {pipeline_mode = #tpu.pipeline_mode<synchronous>, transform_indices = @transform_1, window_bounds = array<i64: 128, 128>}, {pipeline_mode = #tpu.pipeline_mode<synchronous>, transform_indices = @transform_2, window_bounds = array<i64: 128, 512>}, {pipeline_mode = #tpu.pipeline_mode<synchronous>, transform_indices = @transform_3, window_bounds = array<i64: 1, 512>}, {pipeline_mode = #tpu.pipeline_mode<synchronous>, transform_indices = @transform_4, window_bounds = array<i64: 512, 128>}, {pipeline_mode = #tpu.pipeline_mode<synchronous>, transform_indices = @transform_5, window_bounds = array<i64: 1, 128>}, {transform_indices = @transform_6, window_bounds = array<i64: 8, 128>}]} {
    %c0 = arith.constant 0 : index
    %c0_0 = arith.constant 0 : index
    %0 = vector.load %arg1[%c0, %c0_0] : memref<8x128xf32, #tpu.memory_space<vmem>>, vector<8x128xf32>
    %1 = arith.mulf %0, %0 : vector<8x128xf32>
    %cst = arith.constant dense<0.000000e+00> : vector<8xf32>
    %2 = vector.multi_reduction <add>, %1, %cst [1] : vector<8x128xf32> to vector<8xf32>
    %3 = vector.shape_cast %2 : vector<8xf32> to vector<8x1xf32>
    %cst_1 = arith.constant 9.99999993E-9 : f32
    %cst_2 = arith.constant 9.99999993E-9 : f32
    %4 = arith.mulf %cst_1, %cst_2 : f32
    %5 = vector.broadcast %4 : f32 to vector<8x1xf32>
    %6 = arith.maximumf %3, %5 : vector<8x1xf32>
    %7 = math.rsqrt %6 : vector<8x1xf32>
    %8 = arith.truncf %0 : vector<8x128xf32> to vector<8x128xbf16>
    %c0_3 = arith.constant 0 : index
    %c0_4 = arith.constant 0 : index
    %9 = vector.load %arg2[%c0_3, %c0_4] : memref<128x128xbf16, #tpu.memory_space<vmem>>, vector<128x128xbf16>
    %cst_5 = arith.constant dense<0.000000e+00> : vector<8x128xf32>
    %10 = tpu.matmul %8, %9, %cst_5 {dimension_numbers = #tpu.dot_dimension_numbers<[1], [0], [0], [1], [0, 0, 1, 1], [], []>} : vector<8x128xbf16>, vector<128x128xbf16>, vector<8x128xf32> -> vector<8x128xf32>
    %11 = vector.broadcast %7 : vector<8x1xf32> to vector<8x128xf32>
    %12 = arith.mulf %10, %11 : vector<8x128xf32>
    %13 = arith.addf %0, %12 : vector<8x128xf32>
    %14 = arith.truncf %13 : vector<8x128xf32> to vector<8x128xbf16>
    %c0_6 = arith.constant 0 : index
    %c0_7 = arith.constant 0 : index
    %15 = vector.load %arg3[%c0_6, %c0_7] : memref<128x512xbf16, #tpu.memory_space<vmem>>, vector<128x512xbf16>
    %cst_8 = arith.constant dense<0.000000e+00> : vector<8x512xf32>
    %16 = tpu.matmul %14, %15, %cst_8 {dimension_numbers = #tpu.dot_dimension_numbers<[1], [0], [0], [1], [0, 0, 1, 1], [], []>} : vector<8x128xbf16>, vector<128x512xbf16>, vector<8x512xf32> -> vector<8x512xf32>
    %c0_9 = arith.constant 0 : index
    %c0_10 = arith.constant 0 : index
    %17 = vector.load %arg4[%c0_9, %c0_10] : memref<1x512xf32, #tpu.memory_space<vmem>>, vector<1x512xf32>
    %18 = vector.broadcast %17 : vector<1x512xf32> to vector<8x512xf32>
    %19 = arith.addf %16, %18 : vector<8x512xf32>
    %cst_11 = arith.constant 0.000000e+00 : f32
    %20 = vector.broadcast %cst_11 : f32 to vector<8x512xf32>
    %21 = arith.maximumf %19, %20 : vector<8x512xf32>
    %22 = arith.truncf %21 : vector<8x512xf32> to vector<8x512xbf16>
    %c0_12 = arith.constant 0 : index
    %c0_13 = arith.constant 0 : index
    %23 = vector.load %arg5[%c0_12, %c0_13] : memref<512x128xbf16, #tpu.memory_space<vmem>>, vector<512x128xbf16>
    %cst_14 = arith.constant dense<0.000000e+00> : vector<8x128xf32>
    %24 = tpu.matmul %22, %23, %cst_14 {dimension_numbers = #tpu.dot_dimension_numbers<[1], [0], [0], [1], [0, 0, 1, 1], [], []>} : vector<8x512xbf16>, vector<512x128xbf16>, vector<8x128xf32> -> vector<8x128xf32>
    %c0_15 = arith.constant 0 : index
    %c0_16 = arith.constant 0 : index
    %25 = vector.load %arg6[%c0_15, %c0_16] : memref<1x128xf32, #tpu.memory_space<vmem>>, vector<1x128xf32>
    %26 = vector.broadcast %25 : vector<1x128xf32> to vector<8x128xf32>
    %27 = arith.addf %24, %26 : vector<8x128xf32>
    %c0_17 = arith.constant 0 : index
    %c0_18 = arith.constant 0 : index
    %28 = vector.load %arg7[%c0_17, %c0_18] : memref<8x128xf32, #tpu.memory_space<vmem>>, vector<8x128xf32>
    tpu.vector_store %arg7[%c0_17, %c0_18], %27 {strides = array<i32>} : memref<8x128xf32, #tpu.memory_space<vmem>>, vector<8x128xf32>,
    return
  }
  func.func @transform_0(%arg0: i32) -> (i32, i32) {
    %c0_i32 = arith.constant 0 : i32
    %c0_i32_0 = arith.constant 0 : i32
    return %arg0, %c0_i32 : i32, i32
  }
  func.func @transform_1(%arg0: i32) -> (i32, i32) {
    %c0_i32 = arith.constant 0 : i32
    %c0_i32_0 = arith.constant 0 : i32
    %c0_i32_1 = arith.constant 0 : i32
    return %c0_i32, %c0_i32_0 : i32, i32
  }
  func.func @transform_2(%arg0: i32) -> (i32, i32) {
    %c0_i32 = arith.constant 0 : i32
    %c0_i32_0 = arith.constant 0 : i32
    %c0_i32_1 = arith.constant 0 : i32
    return %c0_i32, %c0_i32_0 : i32, i32
  }
  func.func @transform_3(%arg0: i32) -> (i32, i32) {
    %c0_i32 = arith.constant 0 : i32
    %c0_i32_0 = arith.constant 0 : i32
    %c0_i32_1 = arith.constant 0 : i32
    return %c0_i32, %c0_i32_0 : i32, i32
  }
  func.func @transform_4(%arg0: i32) -> (i32, i32) {
    %c0_i32 = arith.constant 0 : i32
    %c0_i32_0 = arith.constant 0 : i32
    %c0_i32_1 = arith.constant 0 : i32
    return %c0_i32, %c0_i32_0 : i32, i32
  }
  func.func @transform_5(%arg0: i32) -> (i32, i32) {
    %c0_i32 = arith.constant 0 : i32
    %c0_i32_0 = arith.constant 0 : i32
    %c0_i32_1 = arith.constant 0 : i32
    return %c0_i32, %c0_i32_0 : i32, i32
  }
  func.func @transform_6(%arg0: i32) -> (i32, i32) {
    %c0_i32 = arith.constant 0 : i32
    %c0_i32_0 = arith.constant 0 : i32
    return %arg0, %c0_i32 : i32, i32
  }
}

</mosaic_0001>

<bundles_post_ra>
// kernel: tpu_custom_call.1
= control target key start
LH: loop header
LB: loop body
LE: loop exit
PB: predicated region body
PF: predicated region fallthrough
CT: control target
= control target key end

     0   :  { %11 = vsyncpa [#allocation3], 0  ;;  %s1294_s0 = inlined_call_operand.hbm [shape: f32[8,128], index: 0, kind: input, shape index: {}]   ;;  %s1295_s1 = inlined_call_operand.hbm [shape: bf16[128,128], index: 1, kind: input, shape index: {}]   ;;  %s1296_s2 = inlined_call_operand.hbm [shape: bf16[128,512], index: 2, kind: input, shape index: {}]   ;;  %s1297_s3 = inlined_call_operand.vmem [shape: f32[1,512], index: 3, kind: input, shape index: {}]   ;;  %s1298_s4 = inlined_call_operand.hbm [shape: bf16[512,128], index: 4, kind: input, shape index: {}]   ;;  %s1299_s5 = inlined_call_operand.vmem [shape: f32[1,128], index: 5, kind: input, shape index: {}]   ;;  %s1300_s6 = inlined_call_operand.hbm [shape: f32[8,128], index: 6, kind: output, shape index: {}]  }
   0x1   :  { %12 = vsyncpa [#allocation6], 0 }
   0x2   :  { %13 = vsyncpa [#allocation9], 0 }
   0x3   :  { %14 = vsyncpa [#allocation4], 0  ;;  %s1213_s21 = smov [#allocation5]  }
   0x4   :  { %s30_s22 = sshll.u32 %s1213_s21, 4  ;;  %s31_s22 = int_to_ptr.vmem [resolvable:$true] %s30_s22 }
   0x5   :  { %s1113_s23 = scalar_lea.vmem %s31_s22, 1024  ;;  %p1118_p1 = scmp.lt.s32.totalorder %s31_s22, %s31_s22 }
   0x6   :  { %p1114_p0 = scmp.ne.s32.totalorder %s31_s22, %s1113_s23  ;;  %p1119_p2 = scmp.lt.s32.totalorder %s1113_s23, %s1113_s23 }
   0x8   :  { %p1120_p3 = por %p1119_p2, %p1118_p1 }
   0xa   :  { %p1121_p4 = pnand %p1120_p3, %p1114_p0 }
   0xc   :  { %1124 = shalt.err (!%p1121_p4)
}
   0xd   :  { %s1214_s24 = smov 64   ;;  %s1215_s25 = smov 4  }
   0xe   :  { %36 = dma.hbm_to_vmem [thread:$0]  %s1295_s1, 1024, %s31_s22, [#allocation6], %s1214_s24, %s1214_s24, %s1215_s25  }
   0xf   :  { %s1216_s28 = smov [#allocation2]   ;;  %s1217_s30 = smov [#allocation7]  }
  0x10   :  { %s21_s29 = sshll.u32 %s1216_s28, 4  ;;  %s42_s7 = sshll.u32 %s1217_s30, 4  ;;  %s22_s29 = int_to_ptr.vmem [resolvable:$true] %s21_s29  ;;  %s43_s7 = int_to_ptr.vmem [resolvable:$true] %s42_s7 }
  0x11   :  { %s1133_s8 = scalar_lea.vmem %s22_s29, 128  ;;  %p1138_p6 = scmp.lt.s32.totalorder %s22_s29, %s22_s29 }
  0x12   :  { %p1134_p5 = scmp.ne.s32.totalorder %s22_s29, %s1133_s8  ;;  %p1139_p7 = scmp.lt.s32.totalorder %s1133_s8, %s1133_s8 }
  0x14   :  { %p1140_p8 = por %p1139_p7, %p1138_p6 }
  0x16   :  { %p1141_p9 = pnand %p1140_p8, %p1134_p5 }
  0x18   :  { %1144 = shalt.err (!%p1141_p9)
}
  0x19   :  { %24 = dma.hbm_to_vmem [thread:$0]  %s1294_s0, 128, %s22_s29, [#allocation3]  }
  0x1a   :  { %s1153_s11 = scalar_lea.vmem %s43_s7, 4096  ;;  %p1158_p11 = scmp.lt.s32.totalorder %s43_s7, %s43_s7 }
  0x1b   :  { %p1154_p10 = scmp.ne.s32.totalorder %s43_s7, %s1153_s11  ;;  %p1159_p12 = scmp.lt.s32.totalorder %s1153_s11, %s1153_s11 }
  0x1d   :  { %p1160_p13 = por %p1159_p12, %p1158_p11 }
  0x1f   :  { %p1161_p0 = pnand %p1160_p13, %p1154_p10 }
  0x21   :  { %1164 = shalt.err (!%p1161_p0)
}
  0x22   :  { %s1218_s1 = smov 256   ;;  %s1219_s12 = smov 16  }
  0x23   :  { %48 = dma.hbm_to_vmem [thread:$0]  %s1296_s2, 4096, %s43_s7, [#allocation6], %s1218_s1, %s1218_s1, %s1219_s12  }
  0x24   :  { %s1220_s15 = smov [#allocation8]  }
  0x25   :  { %s56_s16 = sshll.u32 %s1220_s15, 4  ;;  %s57_s16 = int_to_ptr.vmem [resolvable:$true] %s56_s16 }
  0x26   :  { %s1173_s17 = scalar_lea.vmem %s57_s16, 4096  ;;  %p1178_p2 = scmp.lt.s32.totalorder %s57_s16, %s57_s16 }
  0x27   :  { %p1174_p1 = scmp.ne.s32.totalorder %s57_s16, %s1173_s17  ;;  %p1179_p3 = scmp.lt.s32.totalorder %s1173_s17, %s1173_s17 }
  0x29   :  { %p1180_p4 = por %p1179_p3, %p1178_p2 }
  0x2b   :  { %p1181_p5 = pnand %p1180_p4, %p1174_p1 }
  0x2d   :  { %1184 = shalt.err (!%p1181_p5)
}
  0x2e   :  { %62 = dma.hbm_to_vmem [thread:$0]  %s1298_s4, 4096, %s57_s16, [#allocation9], %s1214_s24, %s1214_s24, %s1215_s25  }
  0x2f   :  { %1205 = dma.done.wait [#allocation3], 128  }
  0x30   :  { %1206 = vsyncadd [#allocation3], 4294967168 }
  0x31   :  { %1207 = dma.done.wait [#allocation6], 5120  }
  0x32   :  { %1208 = vsyncadd [#allocation6], 4294962176 }
  0x33   :  { %1209 = dma.done.wait [#allocation9], 4096  }
  0x34   :  { %1210 = vsyncadd [#allocation9], 4294963200  ;;  %v1221_v0 = vmov 0.0   ;;  %vm1222_vm0 = vmmov 0   ;;  %v1015_v1 = vld [vmem:[#allocation5 + $0x38] sm:$0xff]   ;;  %v1016_v2 = vld [vmem:[#allocation5 + $0x30] sm:$0xff]  }
  0x35   :  { %983 = vmatprep.subr.bf16.mxu0 %v1221_v0  ;;  %999 = vmatprep.mubr.msk.bf16.mxu0 %vm1222_vm0, %v1221_v0  ;;  %v1017_v3 = vld [vmem:[#allocation5 + $0x28] sm:$0xff]   ;;  %v1278_v4 = vld [vmem:[#allocation2] sm:$0xff]  ;;  %v1023_v6 = vld [vmem:[#allocation7 + $0xe4] ss:$16 sps:$4 sm:$0xff]   ;;  %v1223_v44 = vmov 0   ;;  %s1224_s20 = smov [#allocation10]  }
  0x36   :  { %984 = vmatpush3.bf16.msra.mxu0 %v1015_v1  ;;  %v79_v5 = vmul.f32 %v1278_v4, %v1278_v4  ;;  %v1018_v7 = vld [vmem:[#allocation5 + $0x20] sm:$0xff]   ;;  %406 = vmatprep.subr.bf16.mxu1 %v1023_v6  ;;  %v1019_v10 = vld [vmem:[#allocation5 + $0x18] sm:$0xff]   ;;  %v1020_v13 = vld [vmem:[#allocation5 + $0x10] sm:$0xff]   ;;  %v84_v24 = vpack.c.bf16 %v1278_v4, %v1278_v4  ;;  %s846_s21 = sshll.u32 %s1224_s20, 4  ;;  %s847_s21 = int_to_ptr.vmem [resolvable:$true] %s846_s21 }
  0x37   :  { %985 = vmatprep.subr.bf16.mxu0 %v1221_v0  ;;  %v1028_v8 = vld [vmem:[#allocation7 + $0xe0] ss:$16 sps:$4 sm:$0xff]   ;;  %v1029_v9 = vld [vmem:[#allocation7 + $0xc4] ss:$16 sps:$4 sm:$0xff]   ;;  %v1021_v14 = vld [vmem:[#allocation5 + $0x8] sm:$0xff]   ;;  %438 = vmatprep.mubr.bf16.mxu1 %v1223_v44  ;;  %s1185_s22 = scalar_lea.vmem %s847_s21, 128  ;;  %p1190_p7 = scmp.lt.s32.totalorder %s847_s21, %s847_s21 }
  0x38   :  { %80 = vadd.xlane.f32.xlu0 %v79_v5  ;;  %407 = vmatpush1.bf16.msra.mxu1 %v1028_v8  ;;  %v1034_v11 = vld [vmem:[#allocation7 + $0xc0] ss:$16 sps:$4 sm:$0xff]   ;;  %v1035_v12 = vld [vmem:[#allocation7 + $0xa4] ss:$16 sps:$4 sm:$0xff]   ;;  %v1027_v20 = vld [vmem:[#allocation7 + $0xec] ss:$16 sps:$4 sm:$0xff]   ;;  %p1186_p6 = scmp.ne.s32.totalorder %s847_s21, %s1185_s22  ;;  %p1191_p8 = scmp.lt.s32.totalorder %s1185_s22, %s1185_s22 }
  0x39   :  { %408 = vmatprep.subr.bf16.mxu1 %v1029_v9  ;;  %v1040_v15 = vld [vmem:[#allocation7 + $0xa0] ss:$16 sps:$4 sm:$0xff]   ;;  %v1041_v16 = vld [vmem:[#allocation7 + $0x84] ss:$16 sps:$4 sm:$0xff]   ;;  %v1025_v22 = vld [vmem:[#allocation7 + $0xe8] ss:$16 sps:$4 sm:$0xff]  }
  0x3a   :  { %986 = vmatpush3.bf16.msra.mxu0 %v1016_v2  ;;  %v1046_v17 = vld [vmem:[#allocation7 + $0x80] ss:$16 sps:$4 sm:$0xff]   ;;  %v1047_v19 = vld [vmem:[#allocation7 + $0x64] ss:$16 sps:$4 sm:$0xff]   ;;  %v1033_v25 = vld [vmem:[#allocation7 + $0xcc] ss:$16 sps:$4 sm:$0xff]   ;;  %p1192_p9 = por %p1191_p8, %p1190_p7 }
  0x3b   :  { %987 = vmatprep.subr.bf16.mxu0 %v1221_v0  ;;  %v1022_v18 = vld [vmem:[#allocation5] sm:$0xff]   ;;  %v1031_v27 = vld [vmem:[#allocation7 + $0xc8] ss:$16 sps:$4 sm:$0xff]   ;;  %v1039_v29 = vld [vmem:[#allocation7 + $0xac] ss:$16 sps:$4 sm:$0xff]  }
  0x3c   :  { %409 = vmatpush1.bf16.msra.mxu1 %v1034_v11  ;;  %v1052_v21 = vld [vmem:[#allocation7 + $0x60] ss:$16 sps:$4 sm:$0xff]   ;;  %v1053_v23 = vld [vmem:[#allocation7 + $0x44] ss:$16 sps:$4 sm:$0xff]   ;;  %v1037_v30 = vld [vmem:[#allocation7 + $0xa8] ss:$16 sps:$4 sm:$0xff]   ;;  %p1193_p10 = pnand %p1192_p9, %p1186_p6 }
  0x3d   :  { %410 = vmatprep.subr.bf16.mxu1 %v1035_v12  ;;  %v1058_v26 = vld [vmem:[#allocation7 + $0x40] ss:$16 sps:$4 sm:$0xff]   ;;  %v1059_v28 = vld [vmem:[#allocation7 + $0x24] ss:$16 sps:$4 sm:$0xff]   ;;  %v1045_v31 = vld [vmem:[#allocation7 + $0x8c] ss:$16 sps:$4 sm:$0xff]  }
  0x3e   :  { %988 = vmatpush3.bf16.msra.mxu0 %v1017_v3  ;;  %v1043_v32 = vld [vmem:[#allocation7 + $0x88] ss:$16 sps:$4 sm:$0xff]   ;;  %v1051_v33 = vld [vmem:[#allocation7 + $0x6c] ss:$16 sps:$4 sm:$0xff]   ;;  %v1064_v39 = vld [vmem:[#allocation7 + $0x20] ss:$16 sps:$4 sm:$0xff]  }
  0x3f   :  { %989 = vmatprep.subr.bf16.mxu0 %v1221_v0  ;;  %v1049_v34 = vld [vmem:[#allocation7 + $0x68] ss:$16 sps:$4 sm:$0xff]   ;;  %v1057_v35 = vld [vmem:[#allocation7 + $0x4c] ss:$16 sps:$4 sm:$0xff]   ;;  %v1065_v40 = vld [vmem:[#allocation7 + $0x4] ss:$16 sps:$4 sm:$0xff]  }
  0x40   :  { %411 = vmatpush1.bf16.msra.mxu1 %v1040_v15  ;;  %v1055_v36 = vld [vmem:[#allocation7 + $0x48] ss:$16 sps:$4 sm:$0xff]   ;;  %v1063_v37 = vld [vmem:[#allocation7 + $0x2c] ss:$16 sps:$4 sm:$0xff]   ;;  %v1070_v43 = vld [vmem:[#allocation7] ss:$16 sps:$4 sm:$0xff]  }
  0x41   :  { %412 = vmatprep.subr.bf16.mxu1 %v1041_v16  ;;  %v1061_v38 = vld [vmem:[#allocation7 + $0x28] ss:$16 sps:$4 sm:$0xff]   ;;  %v1069_v41 = vld [vmem:[#allocation7 + $0xc] ss:$16 sps:$4 sm:$0xff]   ;;  %v1075_v58 = vld [vmem:[#allocation8 + $0x70] sm:$0xff]  }
  0x42   :  { %990 = vmatpush3.bf16.msra.mxu0 %v1018_v7  ;;  %v1067_v42 = vld [vmem:[#allocation7 + $0x8] ss:$16 sps:$4 sm:$0xff]   ;;  %v1076_v59 = vld [vmem:[#allocation8 + $0xf0] sm:$0xff]   ;;  %v1083_v3 = vld [vmem:[#allocation8 + $0x60] sm:$0xff]  }
  0x43   :  { %991 = vmatprep.subr.bf16.mxu0 %v1221_v0  ;;  %v1071_v45 = vld [vmem:[#allocation8 + $0x78] sm:$0xff]   ;;  %v1077_v61 = vld [vmem:[#allocation8 + $0x30] sm:$0xff]   ;;  %v1079_v63 = vld [vmem:[#allocation8 + $0x68] sm:$0xff]  }
  0x44   :  { %413 = vmatpush1.bf16.msra.mxu1 %v1046_v17  ;;  %v1072_v46 = vld [vmem:[#allocation8 + $0xf8] sm:$0xff]   ;;  %v1078_v62 = vld [vmem:[#allocation8 + $0xb0] sm:$0xff]   ;;  %v1081_v1 = vld [vmem:[#allocation8 + $0x28] sm:$0xff]  }
  0x45   :  { %414 = vmatprep.subr.bf16.mxu1 %v1047_v19  ;;  %v1073_v55 = vld [vmem:[#allocation8 + $0x38] sm:$0xff]   ;;  %v1082_v2 = vld [vmem:[#allocation8 + $0xa8] sm:$0xff]   ;;  %v1085_v5 = vld [vmem:[#allocation8 + $0x20] sm:$0xff]  }
  0x46   :  { %992 = vmatpush3.bf16.msra.mxu0 %v1019_v10  ;;  %v1074_v56 = vld [vmem:[#allocation8 + $0xb8] sm:$0xff]   ;;  %v1086_v6 = vld [vmem:[#allocation8 + $0xa0] sm:$0xff]   ;;  %v1091_v11 = vld [vmem:[#allocation8 + $0x50] sm:$0xff]  }
  0x47   :  { %993 = vmatprep.subr.bf16.mxu0 %v1221_v0  ;;  %v1087_v7 = vld [vmem:[#allocation8 + $0x58] sm:$0xff]   ;;  %v1092_v12 = vld [vmem:[#allocation8 + $0xd0] sm:$0xff]   ;;  %v1095_v15 = vld [vmem:[#allocation8 + $0x48] sm:$0xff]  }
  0x48   :  { %415 = vmatpush1.bf16.msra.mxu1 %v1052_v21  ;;  %v1088_v8 = vld [vmem:[#allocation8 + $0xd8] sm:$0xff]   ;;  %v1096_v16 = vld [vmem:[#allocation8 + $0xc8] sm:$0xff]   ;;  %v1099_v19 = vld [vmem:[#allocation8 + $0x40] sm:$0xff]  }
  0x49   :  { %416 = vmatprep.subr.bf16.mxu1 %v1053_v23  ;;  %v1089_v9 = vld [vmem:[#allocation8 + $0x18] sm:$0xff]   ;;  %v1097_v17 = vld [vmem:[#allocation8 + $0x8] sm:$0xff]   ;;  %v1101_v21 = vld [vmem:[#allocation8] sm:$0xff]   ;;  %v226_v23 = vlaneseq }
  0x4a   :  { %994 = vmatpush3.bf16.msra.mxu0 %v1020_v13  ;;  %v1090_v10 = vld [vmem:[#allocation8 + $0x98] sm:$0xff]   ;;  %v1093_v13 = vld [vmem:[#allocation8 + $0x10] sm:$0xff]  }
  0x4b   :  { %995 = vmatprep.subr.bf16.mxu0 %v1221_v0 }
  0x4c   :  { %417 = vmatpush1.bf16.msra.mxu1 %v1058_v26 }
  0x4d   :  { %418 = vmatprep.subr.bf16.mxu1 %v1059_v28 }
  0x4e   :  { %996 = vmatpush3.bf16.msra.mxu0 %v1021_v14  ;;  %v1094_v14 = vld [vmem:[#allocation8 + $0x90] sm:$0xff]  }
  0x4f   :  { %997 = vmatprep.subr.bf16.mxu0 %v1221_v0  ;;  %v1080_v0 = vld [vmem:[#allocation8 + $0xe8] sm:$0xff]  }
  0x50   :  { %419 = vmatpush1.bf16.msra.mxu1 %v1064_v39 }
  0x51   :  { %420 = vmatprep.subr.bf16.mxu1 %v1065_v40 }
  0x52   :  { %998 = vmatpush3.bf16.msra.mxu0 %v1022_v18  ;;  %v1098_v18 = vld [vmem:[#allocation8 + $0x88] sm:$0xff]  }
  0x53   :  { %447 = vmatprep.subr.bf16.mxu0 %v1027_v20  ;;  %v1100_v20 = vld [vmem:[#allocation8 + $0xc0] sm:$0xff]  }
  0x54   :  { %421 = vmatpush1.bf16.msra.mxu1 %v1070_v43 }
  0x55   :  { %1000 = vmatmul.mubr.bf16.vlgmr.msra.gmra.mxu0 %v84_v24  ;;  %939 = vmatprep.subr.bf16.mxu1 %v1071_v45  ;;  %v227_v24 = vshrl.u32 %v226_v23, 7 }
  0x56   :  { %448 = vmatpush1.bf16.msra.mxu0 %v1025_v22  ;;  %479 = vmatprep.mubr.bf16.mxu0 %v1223_v44  ;;  %v1102_v22 = vld [vmem:[#allocation8 + $0x80] sm:$0xff]  }
  0x57   :  { %449 = vmatprep.subr.bf16.mxu0 %v1033_v25  ;;  %v228_v25 = vsub.s32 0, %v227_v24  ;;  %v236_v26 = vsub.s32 2, %v227_v24  ;;  %v232_v28 = vsub.s32 1, %v227_v24 }
  0x5a   :  { %450 = vmatpush1.bf16.msra.mxu0 %v1031_v27  ;;  %v224_v27 = vld [vmem:[%s1297_s3] sm:$0xf] }
  0x5b   :  { %451 = vmatprep.subr.bf16.mxu0 %v1039_v29  ;;  %v240_v29 = vsub.s32 3, %v227_v24 }
  0x5e   :  { %452 = vmatpush1.bf16.msra.mxu0 %v1037_v30  ;;  %v229_v30 = vrot.slane %v224_v27, %v228_v25 }
  0x5f   :  { %453 = vmatprep.subr.bf16.mxu0 %v1045_v31  ;;  %v237_v31 = vrot.slane %v224_v27, %v236_v26 }
  0x62   :  { %454 = vmatpush1.bf16.msra.mxu0 %v1043_v32  ;;  %v233_v32 = vrot.slane %v224_v27, %v232_v28 }
  0x63   :  { %455 = vmatprep.subr.bf16.mxu0 %v1051_v33  ;;  %v241_v33 = vrot.slane %v224_v27, %v240_v29 }
  0x66   :  { %456 = vmatpush1.bf16.msra.mxu0 %v1049_v34 }
  0x67   :  { %457 = vmatprep.subr.bf16.mxu0 %v1057_v35 }
  0x6a   :  { %458 = vmatpush1.bf16.msra.mxu0 %v1055_v36 }
  0x6b   :  { %459 = vmatprep.subr.bf16.mxu0 %v1063_v37 }
  0x6e   :  { %460 = vmatpush1.bf16.msra.mxu0 %v1061_v38 }
  0x6f   :  { %461 = vmatprep.subr.bf16.mxu0 %v1069_v41 }
  0x72   :  { %462 = vmatpush1.bf16.msra.mxu0 %v1067_v42 }
  0x73   :  { %961 = vmatprep.subr.bf16.mxu0 %v1072_v46 }
  0xc1   :  { %v81_v47 = vpop.xlane.xlu0 %80 }
  0xc2   :  { %v82_v48 = vmax.f32 %v81_v47, 1e-16 }
  0xc4   :  { %1103 = vrsqrt.f32 %v82_v48 }
  0xd1   :  { %v1104_v49 = vpop.eup %1103 }
 0x115   :  { %v183_v50 = vpop.f32.mrf.mxu0 }
 0x116   :  { %v189_v51 = vmul.f32 %v1104_v49, %v183_v50 }
 0x117   :  { %v1001_v52 = vpop.f32.mrf.mxu0 }
 0x118   :  { %v190_v53 = vadd.f32 %v189_v51, %v1278_v4  ;;  %v1084_v4 = vld [vmem:[#allocation8 + $0xe0] sm:$0xff]  }
 0x119   :  { %v186_v54 = vpop.f32.mrf.mxu0 }
 0x11a   :  { %v191_v57 = vpack.c.bf16 %v190_v53, %v190_v53 }
 0x11b   :  { %v1002_v60 = vpop.f32.mrf.mxu0 }
 0x11c   :  { %439 = vmatmul.mubr.bf16.vlgmr.msra.gmra.mxu1 %v191_v57  ;;  %480 = vmatmul.mubr.bf16.vlgmr.msra.gmra.mxu0 %v191_v57 }
 0x11d   :  { %940 = vmatpush3.bf16.msra.mxu1 %v1073_v55  ;;  %962 = vmatpush3.bf16.msra.mxu0 %v1074_v56  ;;  %v897_v56 = vld [vmem:[%s1299_s5] ss:$0 sm:$0xff] }
 0x11e   :  { %941 = vmatprep.subr.bf16.mxu1 %v1075_v58  ;;  %963 = vmatprep.subr.bf16.mxu0 %v1076_v59 }
 0x121   :  { %942 = vmatpush3.bf16.msra.mxu1 %v1077_v61  ;;  %964 = vmatpush3.bf16.msra.mxu0 %v1078_v62 }
 0x122   :  { %943 = vmatprep.subr.bf16.mxu1 %v1079_v63  ;;  %965 = vmatprep.subr.bf16.mxu0 %v1080_v0 }
 0x125   :  { %944 = vmatpush3.bf16.msra.mxu1 %v1081_v1  ;;  %966 = vmatpush3.bf16.msra.mxu0 %v1082_v2 }
 0x126   :  { %945 = vmatprep.subr.bf16.mxu1 %v1083_v3  ;;  %967 = vmatprep.subr.bf16.mxu0 %v1084_v4 }
 0x129   :  { %946 = vmatpush3.bf16.msra.mxu1 %v1085_v5  ;;  %968 = vmatpush3.bf16.msra.mxu0 %v1086_v6 }
 0x12a   :  { %947 = vmatprep.subr.bf16.mxu1 %v1087_v7  ;;  %969 = vmatprep.subr.bf16.mxu0 %v1088_v8 }
 0x12d   :  { %948 = vmatpush3.bf16.msra.mxu1 %v1089_v9  ;;  %970 = vmatpush3.bf16.msra.mxu0 %v1090_v10 }
 0x12e   :  { %949 = vmatprep.subr.bf16.mxu1 %v1091_v11  ;;  %971 = vmatprep.subr.bf16.mxu0 %v1092_v12 }
 0x131   :  { %950 = vmatpush3.bf16.msra.mxu1 %v1093_v13  ;;  %972 = vmatpush3.bf16.msra.mxu0 %v1094_v14 }
 0x132   :  { %951 = vmatprep.subr.bf16.mxu1 %v1095_v15  ;;  %973 = vmatprep.subr.bf16.mxu0 %v1096_v16 }
 0x135   :  { %952 = vmatpush3.bf16.msra.mxu1 %v1097_v17  ;;  %974 = vmatpush3.bf16.msra.mxu0 %v1098_v18 }
 0x136   :  { %953 = vmatprep.subr.bf16.mxu1 %v1099_v19  ;;  %975 = vmatprep.subr.bf16.mxu0 %v1100_v20 }
 0x139   :  { %954 = vmatpush3.bf16.msra.mxu1 %v1101_v21  ;;  %976 = vmatpush3.bf16.msra.mxu0 %v1102_v22 }
 0x1dc   :  { %v440_v34 = vpop.f32.mrf.mxu1  ;;  %v481_v35 = vpop.f32.mrf.mxu0 }
 0x1dd   :  { %v441_v36 = vadd.f32 %v440_v34, %v229_v30  ;;  %v482_v37 = vadd.f32 %v481_v35, %v237_v31 }
 0x1de   :  { %v442_v38 = vpop.f32.mrf.mxu1  ;;  %v483_v39 = vpop.f32.mrf.mxu0 }
 0x1df   :  { %v443_v40 = vadd.f32 %v442_v38, %v233_v32  ;;  %v484_v41 = vadd.f32 %v483_v39, %v241_v33  ;;  %v488_v42 = vmax.f32 %v441_v36, 0.0  ;;  %v490_v43 = vmax.f32 %v482_v37, 0.0 }
 0x1e0   :  { %v444_v44 = vpop.f32.mrf.mxu1  ;;  %v485_v45 = vpop.f32.mrf.mxu0 }
 0x1e1   :  { %v489_v46 = vmax.f32 %v443_v40, 0.0  ;;  %v491_v47 = vmax.f32 %v484_v41, 0.0  ;;  %v492_v52 = vpack.c.bf16 %v488_v42, %v488_v42  ;;  %v494_v53 = vpack.c.bf16 %v490_v43, %v490_v43 }
 0x1e2   :  { %v445_v48 = vpop.f32.mrf.mxu1  ;;  %v486_v49 = vpop.f32.mrf.mxu0 }
 0x1e3   :  { %v493_v50 = vpack.c.bf16 %v489_v46, %v489_v46  ;;  %v495_v51 = vpack.c.bf16 %v491_v47, %v491_v47 }
 0x1e5   :  { %791 = vmatprep.mubr.bf16.mxu1 %v493_v50  ;;  %831 = vmatprep.mubr.bf16.mxu0 %v495_v51 }
 0x1e6   :  { %792 = vmatmul.mubr.bf16.vlgmr.msra.gmra.mxu1 %v492_v52  ;;  %832 = vmatmul.mubr.bf16.vlgmr.msra.gmra.mxu0 %v494_v53 }
 0x2a6   :  { %v955_v54 = vpop.f32.mrf.mxu1  ;;  %v977_v55 = vpop.f32.mrf.mxu0 }
 0x2a8   :  { %v956_v57 = vpop.f32.mrf.mxu1  ;;  %v978_v58 = vpop.f32.mrf.mxu0 }
 0x2a9   :  { %v957_v59 = vadd.f32 %v956_v57, %v955_v54  ;;  %v979_v63 = vadd.f32 %v978_v58, %v977_v55 }
 0x2aa   :  { %v958_v60 = vpop.f32.mrf.mxu1  ;;  %v980_v61 = vpop.f32.mrf.mxu0 }
 0x2ab   :  { %v794_v62 = vadd.f32 %v957_v59, %v897_v56 }
 0x2ac   :  { %v959_v0 = vpop.f32.mrf.mxu1  ;;  %v981_v1 = vpop.f32.mrf.mxu0 }
 0x2ad   :  { %v834_v2 = vadd.f32 %v979_v63, %v794_v62 }
 0x2af   :  { %839 = vst [vmem:[#allocation10] sm:$0xff] %v834_v2 }
 0x2b0   :  { %1196 = shalt.err (!%p1193_p10)
}
 0x2b1   :  { %849 = dma.vmem_to_hbm [thread:$0]  %s847_s21, 128, %s1300_s6, [#allocation4]  }
 0x2b2   :  { %1211 = dma.done.wait [#allocation4], 128  }
 0x2b3   :  { %1212 = vsyncadd [#allocation4], 4294967168 }
 0x2b4   :  { %853 = vsyncpa [#allocation3], 1 }
 0x2b5   :  { %854 = vsyncpa [#allocation6], 1 }
 0x2b6   :  { %855 = vsyncpa [#allocation9], 1 }
 0x2b7   :  { %856 = vsyncpa [#allocation4], 1 }

</bundles_post_ra>
